<compile_context>
chip_gen: v6e
topology: v6e:2x2x1
jax: 0.10.0
libtpu: 0.0.40
codegen_flags: <defaults>
</compile_context>

<pallas_src>
import jax
import jax.numpy as jnp
from jax.experimental import pallas as pl
from jax.experimental.pallas import tpu as pltpu

_LANES = 128      # vreg lane width
_SUBLANES = 8     # vreg sublane count (f32)


def _identity_copy_kernel(obs_ref, out_ref):
    # Straight pass-through of the current tile.
    out_ref[...] = obs_ref[...]


def _pick_row_tile(rows, block_rows):
    """Largest multiple of 8 that divides `rows`, capped at `block_rows`.

    Falls back to the full extent (always a legal BlockSpec dim) when rows is
    not a multiple of 8, so no remainder tile / masking is ever needed.
    """
    block_rows = max(int(block_rows), _SUBLANES)
    if rows % _SUBLANES != 0:
        return rows
    cap = min(block_rows, rows)
    cap -= cap % _SUBLANES
    for cand in range(cap, _SUBLANES - 1, -_SUBLANES):
        if rows % cand == 0:
            return cand
    return rows  # unreachable (8 always divides rows here); kept for safety


def identity_encoder_forward(obs, detach=False, block_rows=512):
    """Pallas implementation of IdentityEncoder.forward: returns obs.

    `detach` only affects autograd in the PyTorch module and has no effect on
    the forward values, so it is ignored here (matches torch semantics).
    """
    del detach
    if obs.size == 0:
        return obs

    orig_shape = obs.shape
    total = obs.size

    # Present a lane-dense 2-D slab to the kernel: full 128-wide lanes give
    # unmasked vector stores (biggest single lever for mem-bound kernels).
    if total % _LANES == 0:
        rows, cols = total // _LANES, _LANES
    elif obs.ndim == 2:
        rows, cols = obs.shape            # keep feature dim on the lane axis
    else:
        rows, cols = 1, total             # single-row, full-extent fallback
    x2d = obs.reshape(rows, cols)

    # Tile the row axis so the copy is a multi-step, double-buffered pipeline.
    # grid=(1,) would serialize DMA-in / DMA-out with no overlap and use only
    # one TensorCore on v7x; tb <= 512 keeps tiles tiny vs. VMEM on all gens.
    tb = _pick_row_tile(rows, block_rows)
    n_steps = rows // tb

    out2d = pl.pallas_call(
        _identity_copy_kernel,
        out_shape=jax.ShapeDtypeStruct((rows, cols), obs.dtype),
        grid=(n_steps,),
        in_specs=[pl.BlockSpec((tb, cols), lambda i: (i, 0))],
        out_specs=pl.BlockSpec((tb, cols), lambda i: (i, 0)),
        # Output aliases the input buffer: no extra HBM allocation; with a
        # donatable input inside a larger jit the copy becomes ~free.
        input_output_aliases={0: 0},
        compiler_params=pltpu.CompilerParams(
            # Single row axis marked "parallel" so v7x can shard grid steps
            # across its two TensorCores.  (Sweep pipeline_mode=pl.Buffered(3)
            # on the specs only if exposed DMA shows up for very large copies.)
            dimension_semantics=("parallel",),
        ),
    )(x2d)

    return out2d.reshape(orig_shape)


class IdentityEncoderPallas:
    """Mirror of the PyTorch IdentityEncoder API (no parameters)."""

    def __init__(self, obs_shape, feature_dim, num_layers, num_filters, *args):
        assert len(obs_shape) == 1
        self.feature_dim = obs_shape[0]

    def forward(self, obs, detach=False):
        return identity_encoder_forward(obs, detach=detach)

    def __call__(self, obs, detach=False):
        return self.forward(obs, detach=detach)

    def copy_conv_weights_from(self, source):
        pass  # no conv weights in an identity encoder

    def log(self, L, step, log_freq):
        pass


if __name__ == "__main__":
    import numpy as np

    key = jax.random.PRNGKey(0)
    k1, k2 = jax.random.split(key)

    # Case 1: lane-aligned input with a small block_rows to exercise the
    # tiled multi-step pipeline path (rows=32, cols=128 -> grid=(4,)).
    obs1 = jax.random.normal(k1, (32, 128), dtype=jnp.float32)
    ref1 = np.asarray(obs1)
    out1 = jax.block_until_ready(identity_encoder_forward(obs1, block_rows=8))
    assert out1.shape == obs1.shape and out1.dtype == obs1.dtype
    np.testing.assert_array_equal(np.asarray(out1), ref1)

    # Case 2: RL-style feature_dim not a multiple of 128 -> full-extent lane
    # fallback path, via the module-level API.
    obs2 = jax.random.normal(k2, (8, 50), dtype=jnp.float32)
    ref2 = np.asarray(obs2)
    enc = IdentityEncoderPallas(
        obs_shape=(50,), feature_dim=32, num_layers=2, num_filters=4)
    out2 = jax.block_until_ready(enc(obs2, detach=True))
    assert out2.shape == obs2.shape and out2.dtype == obs2.dtype
    np.testing.assert_array_equal(np.asarray(out2), ref2)

    print("KERNEL_OK")
</pallas_src>

<mosaic_0001>
module attributes {stable_mosaic.version = 11 : i64} {
  func.func @_identity_copy_kernel(%arg0: i32, %arg1: memref<8x128xf32, #tpu.memory_space<vmem>>, %arg2: memref<8x128xf32, #tpu.memory_space<vmem>>) attributes {dimension_semantics = [#tpu.dimension_semantics<parallel>], iteration_bounds = array<i64: 4>, scalar_prefetch = 0 : i64, scratch_operands = 0 : i64, tpu.core_type = #tpu.core_type<tc>, window_params = [{transform_indices = @transform_0, window_bounds = array<i64: 8, 128>}, {transform_indices = @transform_1, window_bounds = array<i64: 8, 128>}]} {
    %c0 = arith.constant 0 : index
    %c0_0 = arith.constant 0 : index
    %0 = vector.load %arg1[%c0, %c0_0] : memref<8x128xf32, #tpu.memory_space<vmem>>, vector<8x128xf32>
    %c0_1 = arith.constant 0 : index
    %c0_2 = arith.constant 0 : index
    %1 = vector.load %arg2[%c0_1, %c0_2] : memref<8x128xf32, #tpu.memory_space<vmem>>, vector<8x128xf32>
    tpu.vector_store %arg2[%c0_1, %c0_2], %0 {strides = array<i32>} : memref<8x128xf32, #tpu.memory_space<vmem>>, vector<8x128xf32>,
    return
  }
  func.func @transform_0(%arg0: i32) -> (i32, i32) {
    %c0_i32 = arith.constant 0 : i32
    %c0_i32_0 = arith.constant 0 : i32
    return %arg0, %c0_i32 : i32, i32
  }
  func.func @transform_1(%arg0: i32) -> (i32, i32) {
    %c0_i32 = arith.constant 0 : i32
    %c0_i32_0 = arith.constant 0 : i32
    return %arg0, %c0_i32 : i32, i32
  }
}

</mosaic_0001>

<bundles_post_ra>
// kernel: tpu_custom_call.1
= control target key start
LH: loop header
LB: loop body
LE: loop exit
PB: predicated region body
PF: predicated region fallthrough
CT: control target
= control target key end

     0   :  { %6 = vsyncpa [#allocation3], 0  ;;  %s527_s0 = inlined_call_operand.hbm [shape: f32[32,128], index: 0, kind: input, shape index: {}, may-alias: {0,1}]   ;;  %s528_s1 = inlined_call_operand.hbm [shape: f32[32,128], index: 1, kind: output, shape index: {}, may-alias: {0,1}]  }
   0x1   :  { %8 = vsyncpa [#allocation3 + $0x1], 0 }
   0x2   :  { %9 = vsyncpa [#allocation4], 0 }
   0x3   :  { %11 = vsyncpa [#allocation4 + $0x1], 0  ;;  %s382_s6 = smov 0   ;;  %s384_s7 = smov 0  }
   0x4   :  { %s386_s8 = smov 0   ;;  %s388_s9 = smov 0  }
   0x5 LB: > { %s403_s10 = sadd.s32 4294967295, %s368_s9   ;;  %s218_s11 = sadd.s32 4294967294, %s368_s9   ;;  %s368_s9 = sphi %s388_s9, %s544_s9   ;;  %s364_s8 = sphi %s386_s8, %s543_s8   ;;  %s360_s7 = sphi %s384_s7, %s542_s7   ;;  %s356_s6 = sphi %s382_s6, %s541_s6  }
   0x6   : > { %s407_s12 = sadd.s32 1, %s368_s9   ;;  %s24_s13 = sadd.s32 1, %s364_s8 }
   0x7   : > { %s21_s14 = ssub.s32 %s368_s9, %s407_s12  ;;  %p31_p0 = scmp.ne.s32.totalorder %s364_s8, %s360_s7 }
   0x8   : > { %p22_p1 = scmp.eq.s32.totalorder %s21_s14, 0  ;;  %p32_p2 = scmp.eq.s32.totalorder %s368_s9, 0 }
   0x9   : > { %p37_p3 = scmp.ne.s32.totalorder %s360_s7, %s356_s6  ;;  %p38_p4 = scmp.eq.s32.totalorder %s403_s10, 0 }
   0xa   : > { %s419_s15 = scalar_select %p22_p1, %s364_s8, %s24_s13  }
   0xb   : > { %p421_p5 = por %p32_p2, %p31_p0  ;;  %p425_p6 = por %p38_p4, %p37_p3 }
   0xc   : > { %p61_p7 = scmp.eq.s32.totalorder %s403_s10, 3  ;;  %p67_p8 = scmp.eq.s32.totalorder %s218_s11, 3 }
   0xd   : > { %s532_s17 = scalar_select %p425_p6, 1, 0 }
   0xe   : > { %p242_p9 = scmp.lt.s32.totalorder %s368_s9, 4  ;;  %p431_p10 = por %p61_p7, %p31_p0 }
   0xf   : > { %p435_p11 = por %p67_p8, %p37_p3  ;;  %s87_s20 = sand.u32 1, %s364_s8  }
  0x10   : > { %s533_s18 = scalar_select %p431_p10, 1, 0 }
  0x11   : > { %s534_s19 = scalar_select %p435_p11, 1, 0 }
  0x12   : > { %s222_s21 = sshll.u32 %s368_s9, 7  ;;  %s221_s22 = sshll.u32 %s87_s20, 3 }
  0x13   : > { %s444_s25 = scalar_lea.hbm %s527_s0, %s222_s21  ;;  %s91_s26 = scalar_lea.vmem [#allocation2], %s221_s22 }
  0x14   : > { %s98_s27 = sshll.u32 %s91_s26, 4  ;;  %p448_p12 = pnand %p242_p9, %p421_p5  ;;  %s452_s27 = int_to_ptr.vmem [resolvable:$true] %s98_s27 }
  0x15   : > { %s88_s29 = scalar_lea.sflag [#allocation3], %s87_s20  ;;  %s276_s30 = scalar_lea.hbm %s444_s25, 128 }
  0x16   : > { %p277_p1 = scmp.ne.s32.totalorder %s444_s25, %s276_s30  ;;  %p278_p2 = pneg %p448_p12 }
  0x17   : > { %s281_s4 = scalar_lea.hbm %s527_s0, 512  ;;  %p282_p5 = scmp.lt.s32.totalorder %s444_s25, %s527_s0 }
  0x18   : > { %p279_p3 = pnand %p278_p2, %p277_p1  ;;  %p283_p7 = scmp.lt.s32.totalorder %s281_s4, %s276_s30 }
  0x1a   : > { %p280_p4 = pneg %p279_p3  ;;  %p284_p8 = por %p283_p7, %p282_p5 }
  0x1c   : > { %p285_p9 = pnand %p284_p8, %p280_p4 }
  0x1e   : > { %288 = shalt.err (!%p285_p9)
}
  0x1f   : > { %s289_s13 = scalar_lea.vmem %s452_s27, 128  ;;  %s370_s14 = smov [#allocation2]  }
  0x20   : > { %p290_p13 = scmp.ne.s32.totalorder %s452_s27, %s289_s13  ;;  %s294_s16 = sshll.u32 %s370_s14, 4  ;;  %s295_s16 = int_to_ptr.vmem [resolvable:$false] %s294_s16 }
  0x21   : > { %s296_s20 = scalar_lea.vmem %s295_s16, 256  ;;  %p297_p3 = scmp.lt.s32.totalorder %s452_s27, %s295_s16 }
  0x22   : > { %p292_p0 = pnand %p290_p13, %p278_p2  ;;  %p298_p11 = scmp.lt.s32.totalorder %s296_s20, %s289_s13 }
  0x24   : > { %p293_p1 = pneg %p292_p0  ;;  %p299_p10 = por %p298_p11, %p297_p3 }
  0x26   : > { %p300_p6 = pnand %p299_p10, %p293_p1 }
  0x28   : > { %303 = shalt.err (!%p300_p6)
}
  0x29   : > { %237 = dma.hbm_to_vmem [thread:$0]  (!%p448_p12), %s444_s25, 128, %s452_s27, %s88_s29  }
  0x2a   : > { %p536_p4 = scmp.lt.s32.totalorder %s368_s9, 5  ;;  %p537_p5 = scmp.ge.s32.totalorder %s368_s9, 1 }
  0x2c   : > { %p104_p13 = pnand %p537_p5, %p536_p4 }
  0x2d   : > { %s479_s21 = sand.u32 (!%p104_p13), 1, %s360_s7   ;;  %p538_p6 = scmp.ne.s32.totalorder (!%p104_p13), %s532_s17, 0 }
  0x2e   : > { %107 = sbr.rel (%p104_p13) target bundleno = 77 (0x4d), region = 24  ;;  %s224_s22 = sshll.u32 (!%p104_p13), %s479_s21, 3 }
  0x2f   : > { %s110_s23 = scalar_lea.sflag (!%p104_p13), [#allocation3], %s479_s21  ;;  %s113_s24 = scalar_lea.vmem (!%p104_p13), [#allocation2], %s224_s22 }
  0x33   : > { %347 = dma.done.wait (%p538_p6), %s110_s23, 128  }
  0x34   : > { %349 = vsyncadd (%p538_p6), %s110_s23, 4294967168  ;;  %s131_s25 = scalar_lea.vmem [#allocation5], %s224_s22  ;;  %s227_s27 = sshll.u32 %s403_s10, 7  ;;  %v132_v0 = vld [vmem:[%s113_s24] sm:$0xff] }
  0x35   : > { %s148_s26 = sshll.u32 %s131_s25, 4  ;;  %s146_s30 = scalar_lea.hbm %s528_s1, %s227_s27  ;;  %133 = vst [vmem:[%s131_s25] sm:$0xff] %v132_v0  ;;  %s488_s26 = int_to_ptr.vmem [resolvable:$true] %s148_s26 }
  0x36   : > { %s135_s2 = scalar_lea.sflag [#allocation4], %s479_s21  ;;  %s304_s17 = scalar_lea.vmem %s488_s26, 128 }
  0x37   : > { %p305_p10 = scmp.ne.s32.totalorder %s488_s26, %s304_s17  ;;  %p539_p11 = scmp.ne.s32.totalorder %s533_s18, 0 }
  0x38   : > { %s371_s3 = smov [#allocation5]  }
  0x39   : > { %p306_p12 = pnand %p305_p10, %p539_p11  ;;  %s308_s4 = sshll.u32 %s371_s3, 4  ;;  %s309_s4 = int_to_ptr.vmem [resolvable:$false] %s308_s4 }
  0x3a   : > { %s310_s10 = scalar_lea.vmem %s309_s4, 256  ;;  %p311_p2 = scmp.lt.s32.totalorder %s488_s26, %s309_s4 }
  0x3b   : > { %p307_p0 = pneg %p306_p12  ;;  %p312_p7 = scmp.lt.s32.totalorder %s310_s10, %s304_s17 }
  0x3d   : > { %p313_p8 = por %p312_p7, %p311_p2 }
  0x3f   : > { %p314_p9 = pnand %p313_p8, %p307_p0 }
  0x41   : > { %317 = shalt.err (!%p314_p9)
}
  0x42   : > { %s318_s5 = scalar_lea.hbm %s146_s30, 128  ;;  %s322_s14 = scalar_lea.hbm %s528_s1, 512 }
  0x43   : > { %p319_p1 = scmp.ne.s32.totalorder %s146_s30, %s318_s5  ;;  %p323_p5 = scmp.lt.s32.totalorder %s146_s30, %s528_s1 }
  0x44   : > { %p324_p13 = scmp.lt.s32.totalorder %s322_s14, %s318_s5 }
  0x45   : > { %p320_p3 = pnand %p319_p1, %p539_p11 }
  0x46   : > { %p325_p6 = por %p324_p13, %p323_p5 }
  0x47   : > { %p321_p4 = pneg %p320_p3 }
  0x49   : > { %p326_p10 = pnand %p325_p6, %p321_p4 }
  0x4b   : > { %329 = shalt.err (!%p326_p10)
}
  0x4c   : > { %232 = dma.vmem_to_hbm [thread:$0]  (%p539_p11), %s488_s26, 128, %s146_s30, %s135_s2  }
  0x4d PF: > { %p243_p12 = scmp.ge.s32.totalorder %s368_s9, 2  ;;  %s160_s21 = sand.u32 1, %s356_s6  }
  0x4e   : > { %p540_p0 = scmp.ne.s32.totalorder %s534_s19, 0  ;;  %s161_s22 = scalar_lea.sflag [#allocation4], %s160_s21 }
  0x50   : > { %p239_p2 = pnand %p243_p12, %p540_p0 }
  0x52   : > { %p240_p7 = pneg %p239_p2 }
  0x54   : > { %351 = dma.done.wait (%p240_p7), %s161_s22, 128  }
  0x55   : > { %353 = vsyncadd (%p240_p7), %s161_s22, 4294967168  ;;  %p14_p8 = scmp.ge.s32.totalorder %s407_s12, 6   ;;  %s541_s6 = smov %s360_s7 }
  0x56   : > { %s542_s7 = smov %s364_s8  ;;  %s543_s8 = smov %s419_s15 }
  0x57   : > { %s544_s9 = smov %s407_s12  ;;  %16 = sbr.rel (!%p14_p8) target bundleno = 5 (0x5), region = 69 }
  0x5c   :  { %166 = vsyncpa [#allocation3], 1 }
  0x5d   :  { %168 = vsyncpa [#allocation3 + $0x1], 1 }
  0x5e   :  { %169 = vsyncpa [#allocation4], 1 }
  0x5f   :  { %171 = vsyncpa [#allocation4 + $0x1], 1 }

</bundles_post_ra>
